<compile_context>
chip_gen: v7x
topology: tpu7x:2x2x1
jax: 0.10.0
libtpu: 0.0.40
codegen_flags: <defaults>
</compile_context>

<pallas_src>
import functools

import jax
import jax.numpy as jnp
from jax.experimental import pallas as pl
from jax.experimental.pallas import tpu as pltpu

BN_EPS = 1e-5

# Below this batch size the 1-row bias-fold matmuls cost more (MXU fill/drain)
# than a fused VPU broadcast add; above it the fold is cheaper and more precise.
_SMALL_BATCH_MAX = 256


@functools.lru_cache(maxsize=None)
def _vmem_limit_bytes():
    """Per-chip VMEM budget: leave ~24 MiB headroom for compiler scratch.

    => ~40 MiB on v7x (64 MiB physical), capped at ~100 MiB on v5e/v6e (128 MiB).
    """
    try:
        cap = int(pltpu.get_tpu_info().vmem_capacity_bytes)
        return max(32 * 1024 * 1024, min(cap - 24 * 1024 * 1024, 100 * 1024 * 1024))
    except Exception:
        return 40 * 1024 * 1024  # conservative default, safe on all current chips


def _make_encoder_kernel(fold_bias_via_matmul):
    """Fused Linear->BN->Linear->BN->Linear kernel (single shot, no grid)."""

    def kernel(x_ref, w1_ref, w2_ref, w3_ref, v1_ref, v2_ref, b3_ref, out_ref):
        n = x_ref.shape[0]
        inv_n = 1.0 / float(n)

        # fp32 -> bf16 cast in-register (x is DMA'd once in its original dtype).
        x = x_ref[...].astype(jnp.bfloat16)
        w2 = w2_ref[...]
        w3 = w3_ref[...]

        def bn_fold(h, gb_ref):
            # Training-mode BN over the batch, fp32, single pass:
            #   mu = E[h], var = E[h^2] - mu^2 (biased, clamped >= 0)
            # Folded to an affine map: bn(h) = h * s + t.
            mu = jnp.sum(h, axis=0, keepdims=True) * inv_n
            ex2 = jnp.sum(h * h, axis=0, keepdims=True) * inv_n
            var = jnp.maximum(ex2 - mu * mu, 0.0)
            s = gb_ref[0:1, :] * jax.lax.rsqrt(var + BN_EPS)   # gamma * rsqrt(var+eps)
            t = gb_ref[1:2, :] - mu * s                        # beta - mu * s
            return s, t

        # ---- Linear 1 (bf16 MXU, fp32 accumulate).  b1 is dropped: a constant
        # row shift cancels exactly through the following training-mode BN. ----
        h1 = jnp.dot(x, w1_ref[...], preferred_element_type=jnp.float32)
        s1, t1 = bn_fold(h1, v1_ref)

        # ---- BN1 folded into Linear 2 (b2 also cancels through BN2). ----
        if fold_bias_via_matmul:
            h2 = (jnp.dot((h1 * s1).astype(jnp.bfloat16), w2,
                          preferred_element_type=jnp.float32)
                  + jnp.dot(t1.astype(jnp.bfloat16), w2,
                            preferred_element_type=jnp.float32))
        else:
            # Small-batch: broadcast add on the VPU instead of a 1-row matmul.
            h2 = jnp.dot((h1 * s1 + t1).astype(jnp.bfloat16), w2,
                         preferred_element_type=jnp.float32)

        s2, t2 = bn_fold(h2, v2_ref)

        # ---- BN2 folded into Linear 3; b3 added in fp32. ----
        if fold_bias_via_matmul:
            y = (jnp.dot((h2 * s2).astype(jnp.bfloat16), w3,
                         preferred_element_type=jnp.float32)
                 + (jnp.dot(t2.astype(jnp.bfloat16), w3,
                            preferred_element_type=jnp.float32) + b3_ref[...]))
        else:
            y = jnp.dot((h2 * s2 + t2).astype(jnp.bfloat16), w3,
                        preferred_element_type=jnp.float32) + b3_ref[...]

        out_ref[...] = y.astype(out_ref.dtype)

    return kernel


@jax.jit
def encoder_forward(x, params):
    """x: (N, in_features) fp32. Returns (1, N, CNN_embed_dim) = torch.unsqueeze(out, 0)."""
    (w1, b1, g1, be1, w2, b2, g2, be2, w3, b3) = params
    del b1, b2  # cancel exactly through training-mode BatchNorm (see header)

    n, _ = x.shape
    e = w3.shape[1]

    # MXU operands in bf16; per-feature BN vectors packed per layer (fp32):
    # row 0 = gamma, row 1 = beta.
    w1b = w1.astype(jnp.bfloat16)
    w2b = w2.astype(jnp.bfloat16)
    w3b = w3.astype(jnp.bfloat16)
    v1 = jnp.concatenate([g1, be1], axis=0)   # (2, fc_hidden1)
    v2 = jnp.concatenate([g2, be2], axis=0)   # (2, fc_hidden2)

    full = lambda a: pl.BlockSpec(a.shape, lambda: (0, 0))

    out = pl.pallas_call(
        _make_encoder_kernel(fold_bias_via_matmul=(n >= _SMALL_BATCH_MAX)),
        out_shape=jax.ShapeDtypeStruct((n, e), jnp.float32),
        in_specs=[full(x), full(w1b), full(w2b), full(w3b),
                  full(v1), full(v2), full(b3)],
        out_specs=pl.BlockSpec((n, e), lambda: (0, 0)),
        compiler_params=pltpu.CompilerParams(vmem_limit_bytes=_vmem_limit_bytes()),
    )(x, w1b, w2b, w3b, v1, v2, b3)

    # unsqueeze(0) is pure layout glue (free reshape), done outside the kernel.
    return out[None, ...]


def init_params(key, in_features, fc_hidden1, fc_hidden2, embed_dim):
    """Deterministic synthetic parameters (Linear weights stored pre-transposed as (in, out)).

    gamma/beta are perturbed away from their (1, 0) init so the BN-fold and the
    b1/b2-cancellation algebra are actually exercised by the correctness check.
    """
    ks = jax.random.split(key, 10)
    scale = 0.05
    w1 = scale * jax.random.normal(ks[0], (in_features, fc_hidden1), jnp.float32)
    b1 = scale * jax.random.normal(ks[1], (1, fc_hidden1), jnp.float32)
    g1 = 1.0 + 0.1 * jax.random.normal(ks[2], (1, fc_hidden1), jnp.float32)
    be1 = 0.1 * jax.random.normal(ks[3], (1, fc_hidden1), jnp.float32)
    w2 = scale * jax.random.normal(ks[4], (fc_hidden1, fc_hidden2), jnp.float32)
    b2 = scale * jax.random.normal(ks[5], (1, fc_hidden2), jnp.float32)
    g2 = 1.0 + 0.1 * jax.random.normal(ks[6], (1, fc_hidden2), jnp.float32)
    be2 = 0.1 * jax.random.normal(ks[7], (1, fc_hidden2), jnp.float32)
    w3 = scale * jax.random.normal(ks[8], (fc_hidden2, embed_dim), jnp.float32)
    b3 = scale * jax.random.normal(ks[9], (1, embed_dim), jnp.float32)
    return (w1, b1, g1, be1, w2, b2, g2, be2, w3, b3)


def encoder_ref(x, params):
    """Pure-JAX fp32 reference with exact PyTorch training-mode BN semantics
    (biases b1/b2 included here; the kernel drops them because they cancel)."""
    (w1, b1, g1, be1, w2, b2, g2, be2, w3, b3) = params

    def bn(h, g, be):
        mu = jnp.mean(h, axis=0, keepdims=True)
        var = jnp.mean((h - mu) ** 2, axis=0, keepdims=True)
        return (h - mu) / jnp.sqrt(var + BN_EPS) * g + be

    h = bn(x @ w1 + b1, g1, be1)
    h = bn(h @ w2 + b2, g2, be2)
    y = h @ w3 + b3
    return y[None, ...]


if __name__ == "__main__":
    # Small shapes consistent with the module.  Batch N deliberately not a
    # multiple of 8 and feature dims not multiples of 128 to exercise the
    # unpadded full-array paths.
    N, in_features, fc_h1, fc_h2, embed = 12, 48, 64, 64, 40

    key = jax.random.PRNGKey(0)
    kx, kp = jax.random.split(key)
    x = jax.random.normal(kx, (N, in_features), jnp.float32)
    params = init_params(kp, in_features, fc_h1, fc_h2, embed)

    out = jax.block_until_ready(encoder_forward(x, params))

    ref = encoder_ref(x, params)
    assert out.shape == (1, N, embed), out.shape
    # bf16 MXU operands => relaxed tolerance vs. the fp32 reference.
    err = float(jnp.max(jnp.abs(out - ref)))
    assert jnp.allclose(out, ref, atol=6e-2, rtol=6e-2), err

    # TODO(synk): PackedSequence branch is a pure container re-wrap in PyTorch;
    # the dense-tensor path (out = unsqueeze(fc(x), 0)) is what is implemented here.
    print("KERNEL_OK")
</pallas_src>

<mosaic_0001>
module attributes {stable_mosaic.version = 11 : i64} {
  func.func @kernel(%arg0: memref<12x48xf32, #tpu.memory_space<vmem>>, %arg1: memref<48x64xbf16, #tpu.memory_space<vmem>>, %arg2: memref<64x64xbf16, #tpu.memory_space<vmem>>, %arg3: memref<64x40xbf16, #tpu.memory_space<vmem>>, %arg4: memref<2x64xf32, #tpu.memory_space<vmem>>, %arg5: memref<2x64xf32, #tpu.memory_space<vmem>>, %arg6: memref<1x40xf32, #tpu.memory_space<vmem>>, %arg7: memref<12x40xf32, #tpu.memory_space<vmem>>) attributes {dimension_semantics = [], scalar_prefetch = 0 : i64, scratch_operands = 0 : i64, tpu.core_type = #tpu.core_type<tc>} {
    %c0 = arith.constant 0 : index
    %c0_0 = arith.constant 0 : index
    %0 = vector.load %arg0[%c0, %c0_0] : memref<12x48xf32, #tpu.memory_space<vmem>>, vector<12x48xf32>
    %1 = arith.truncf %0 : vector<12x48xf32> to vector<12x48xbf16>
    %c0_1 = arith.constant 0 : index
    %c0_2 = arith.constant 0 : index
    %2 = vector.load %arg2[%c0_1, %c0_2] : memref<64x64xbf16, #tpu.memory_space<vmem>>, vector<64x64xbf16>
    %c0_3 = arith.constant 0 : index
    %c0_4 = arith.constant 0 : index
    %3 = vector.load %arg3[%c0_3, %c0_4] : memref<64x40xbf16, #tpu.memory_space<vmem>>, vector<64x40xbf16>
    %c0_5 = arith.constant 0 : index
    %c0_6 = arith.constant 0 : index
    %4 = vector.load %arg1[%c0_5, %c0_6] : memref<48x64xbf16, #tpu.memory_space<vmem>>, vector<48x64xbf16>
    %cst = arith.constant dense<0.000000e+00> : vector<12x64xf32>
    %5 = tpu.matmul %1, %4, %cst {dimension_numbers = #tpu.dot_dimension_numbers<[1], [0], [0], [1], [0, 0, 1, 1], [], []>} : vector<12x48xbf16>, vector<48x64xbf16>, vector<12x64xf32> -> vector<12x64xf32>
    %cst_7 = arith.constant dense<0.000000e+00> : vector<64xf32>
    %6 = vector.multi_reduction <add>, %5, %cst_7 [0] : vector<12x64xf32> to vector<64xf32>
    %7 = vector.shape_cast %6 : vector<64xf32> to vector<1x64xf32>
    %cst_8 = arith.constant 0.0833333358 : f32
    %8 = vector.broadcast %cst_8 : f32 to vector<1x64xf32>
    %9 = arith.mulf %7, %8 : vector<1x64xf32>
    %10 = arith.mulf %5, %5 : vector<12x64xf32>
    %cst_9 = arith.constant dense<0.000000e+00> : vector<64xf32>
    %11 = vector.multi_reduction <add>, %10, %cst_9 [0] : vector<12x64xf32> to vector<64xf32>
    %12 = vector.shape_cast %11 : vector<64xf32> to vector<1x64xf32>
    %cst_10 = arith.constant 0.0833333358 : f32
    %13 = vector.broadcast %cst_10 : f32 to vector<1x64xf32>
    %14 = arith.mulf %12, %13 : vector<1x64xf32>
    %15 = arith.mulf %9, %9 : vector<1x64xf32>
    %16 = arith.subf %14, %15 : vector<1x64xf32>
    %cst_11 = arith.constant 0.000000e+00 : f32
    %17 = vector.broadcast %cst_11 : f32 to vector<1x64xf32>
    %18 = arith.maximumf %16, %17 : vector<1x64xf32>
    %c0_12 = arith.constant 0 : index
    %c0_13 = arith.constant 0 : index
    %19 = vector.load %arg4[%c0_12, %c0_13] : memref<2x64xf32, #tpu.memory_space<vmem>>, vector<1x64xf32>
    %cst_14 = arith.constant 9.99999974E-6 : f32
    %20 = vector.broadcast %cst_14 : f32 to vector<1x64xf32>
    %21 = arith.addf %18, %20 : vector<1x64xf32>
    %22 = math.rsqrt %21 : vector<1x64xf32>
    %23 = arith.mulf %19, %22 : vector<1x64xf32>
    %c1 = arith.constant 1 : index
    %c0_15 = arith.constant 0 : index
    %24 = vector.load %arg4[%c1, %c0_15] : memref<2x64xf32, #tpu.memory_space<vmem>>, vector<1x64xf32>
    %25 = arith.mulf %9, %23 : vector<1x64xf32>
    %26 = arith.subf %24, %25 : vector<1x64xf32>
    %27 = vector.broadcast %23 : vector<1x64xf32> to vector<12x64xf32>
    %28 = arith.mulf %5, %27 : vector<12x64xf32>
    %29 = vector.broadcast %26 : vector<1x64xf32> to vector<12x64xf32>
    %30 = arith.addf %28, %29 : vector<12x64xf32>
    %31 = arith.truncf %30 : vector<12x64xf32> to vector<12x64xbf16>
    %cst_16 = arith.constant dense<0.000000e+00> : vector<12x64xf32>
    %32 = tpu.matmul %31, %2, %cst_16 {dimension_numbers = #tpu.dot_dimension_numbers<[1], [0], [0], [1], [0, 0, 1, 1], [], []>} : vector<12x64xbf16>, vector<64x64xbf16>, vector<12x64xf32> -> vector<12x64xf32>
    %cst_17 = arith.constant dense<0.000000e+00> : vector<64xf32>
    %33 = vector.multi_reduction <add>, %32, %cst_17 [0] : vector<12x64xf32> to vector<64xf32>
    %34 = vector.shape_cast %33 : vector<64xf32> to vector<1x64xf32>
    %cst_18 = arith.constant 0.0833333358 : f32
    %35 = vector.broadcast %cst_18 : f32 to vector<1x64xf32>
    %36 = arith.mulf %34, %35 : vector<1x64xf32>
    %37 = arith.mulf %32, %32 : vector<12x64xf32>
    %cst_19 = arith.constant dense<0.000000e+00> : vector<64xf32>
    %38 = vector.multi_reduction <add>, %37, %cst_19 [0] : vector<12x64xf32> to vector<64xf32>
    %39 = vector.shape_cast %38 : vector<64xf32> to vector<1x64xf32>
    %cst_20 = arith.constant 0.0833333358 : f32
    %40 = vector.broadcast %cst_20 : f32 to vector<1x64xf32>
    %41 = arith.mulf %39, %40 : vector<1x64xf32>
    %42 = arith.mulf %36, %36 : vector<1x64xf32>
    %43 = arith.subf %41, %42 : vector<1x64xf32>
    %cst_21 = arith.constant 0.000000e+00 : f32
    %44 = vector.broadcast %cst_21 : f32 to vector<1x64xf32>
    %45 = arith.maximumf %43, %44 : vector<1x64xf32>
    %c0_22 = arith.constant 0 : index
    %c0_23 = arith.constant 0 : index
    %46 = vector.load %arg5[%c0_22, %c0_23] : memref<2x64xf32, #tpu.memory_space<vmem>>, vector<1x64xf32>
    %cst_24 = arith.constant 9.99999974E-6 : f32
    %47 = vector.broadcast %cst_24 : f32 to vector<1x64xf32>
    %48 = arith.addf %45, %47 : vector<1x64xf32>
    %49 = math.rsqrt %48 : vector<1x64xf32>
    %50 = arith.mulf %46, %49 : vector<1x64xf32>
    %c1_25 = arith.constant 1 : index
    %c0_26 = arith.constant 0 : index
    %51 = vector.load %arg5[%c1_25, %c0_26] : memref<2x64xf32, #tpu.memory_space<vmem>>, vector<1x64xf32>
    %52 = arith.mulf %36, %50 : vector<1x64xf32>
    %53 = arith.subf %51, %52 : vector<1x64xf32>
    %54 = vector.broadcast %50 : vector<1x64xf32> to vector<12x64xf32>
    %55 = arith.mulf %32, %54 : vector<12x64xf32>
    %56 = vector.broadcast %53 : vector<1x64xf32> to vector<12x64xf32>
    %57 = arith.addf %55, %56 : vector<12x64xf32>
    %58 = arith.truncf %57 : vector<12x64xf32> to vector<12x64xbf16>
    %cst_27 = arith.constant dense<0.000000e+00> : vector<12x40xf32>
    %59 = tpu.matmul %58, %3, %cst_27 {dimension_numbers = #tpu.dot_dimension_numbers<[1], [0], [0], [1], [0, 0, 1, 1], [], []>} : vector<12x64xbf16>, vector<64x40xbf16>, vector<12x40xf32> -> vector<12x40xf32>
    %c0_28 = arith.constant 0 : index
    %c0_29 = arith.constant 0 : index
    %60 = vector.load %arg6[%c0_28, %c0_29] : memref<1x40xf32, #tpu.memory_space<vmem>>, vector<1x40xf32>
    %61 = vector.broadcast %60 : vector<1x40xf32> to vector<12x40xf32>
    %62 = arith.addf %59, %61 : vector<12x40xf32>
    %c0_30 = arith.constant 0 : index
    %c0_31 = arith.constant 0 : index
    %63 = vector.load %arg7[%c0_30, %c0_31] : memref<12x40xf32, #tpu.memory_space<vmem>>, vector<12x40xf32>
    tpu.vector_store %arg7[%c0_30, %c0_31], %62 {strides = array<i32>} : memref<12x40xf32, #tpu.memory_space<vmem>>, vector<12x40xf32>,
    return
  }
}

</mosaic_0001>

<bundles_post_ra>
// kernel: encoder_forward.1
= control target key start
LH: loop header
LB: loop body
LE: loop exit
PB: predicated region body
PF: predicated region fallthrough
CT: control target
= control target key end

     0   :  { %v438_v0 = vmov 0.0   ;;  %vm439_vm0 = vmmov 0   ;;  %vm70_vm1 = vcmask 392192   ;;  %vm115_vm2 = vcmask 523264   ;;  %s573_s1 = inlined_call_operand.vmem [shape: bf16[48,64], index: 1, kind: input, shape index: {}]   ;;  %s574_s0 = inlined_call_operand.vmem [shape: f32[12,48], index: 0, kind: input, shape index: {}]   ;;  %s575_s2 = inlined_call_operand.vmem [shape: bf16[64,64], index: 2, kind: input, shape index: {}]   ;;  %s576_s4 = inlined_call_operand.vmem [shape: f32[2,64], index: 4, kind: input, shape index: {}]   ;;  %s577_s3 = inlined_call_operand.vmem [shape: bf16[64,40], index: 3, kind: input, shape index: {}]   ;;  %s578_s5 = inlined_call_operand.vmem [shape: f32[2,64], index: 5, kind: input, shape index: {}]   ;;  %s579_s6 = inlined_call_operand.vmem [shape: f32[1,40], index: 6, kind: input, shape index: {}]   ;;  %s580_s7 = inlined_call_operand.vmem [shape: f32[12,40], index: 7, kind: output, shape index: {}]  }
   0x1   :  { %387 = vmatprep.subr.bf16.mxu0 %v438_v0  ;;  %v423_v1 = vld [vmem:[%s573_s1] sm:$0xff]   ;;  %393 = vmatprep.mubr.msk.bf16.mxu0 %vm439_vm0, %v438_v0  ;;  %v424_v2 = vld [vmem:[%s573_s1 + $0x8] sm:$0xff]   ;;  %v425_v3 = vld [vmem:[%s573_s1 + $0x10] sm:$0xff]   ;;  %vm117_vm3 = vcmask 519168   ;;  %v149_v41 = vlaneseq  ;;  %vm350_vm4 = vcmask 326656   ;;  %vm352_vm5 = vcmask 322560  }
   0x2   :  { %397 = vmatprep.subr.bf16.mxu1 %v438_v0  ;;  %405 = vmatprep.mubr.msk.bf16.mxu1 %vm439_vm0, %v438_v0  ;;  %v27_v4 = vld [vmem:[%s574_s0] sm:$0xff]  ;;  %v28_v5 = vld [vmem:[%s574_s0 + $0x8] sm:$0xf]  ;;  %v428_v9 = vld [vmem:[%s575_s2 + $0x10] sm:$0xff]  }
   0x3   :  { %388 = vmatpush3.bf16.msra.mxu0 %v423_v1  ;;  %v29_v6 = vpack.c.bf16 %v28_v5, %v27_v4  ;;  %v426_v7 = vld [vmem:[%s575_s2] sm:$0xff]   ;;  %v427_v8 = vld [vmem:[%s575_s2 + $0x8] sm:$0xff]   ;;  %v429_v10 = vld [vmem:[%s575_s2 + $0x18] sm:$0xff]   ;;  %v150_v42 = vshrl.u32 %v149_v41, 7 }
   0x4   :  { %389 = vmatprep.subr.bf16.mxu0 %v438_v0  ;;  %398 = vmatpush3.bf16.msra.mxu1 %v426_v7  ;;  %v142_v43 = vld [vmem:[%s576_s4] sm:$0x1]  ;;  %v146_v47 = vld [vmem:[%s576_s4 + $0x1] sm:$0x1]  ;;  %v431_v58 = vld [vmem:[%s577_s3 + $0x8] sm:$0xff]  }
   0x5   :  { %399 = vmatprep.subr.bf16.mxu1 %v438_v0  ;;  %v528_v44 = vsub.s32 0, %v150_v42  ;;  %v430_v57 = vld [vmem:[%s577_s3] sm:$0xff]   ;;  %v432_v59 = vld [vmem:[%s577_s3 + $0x10] sm:$0xff]   ;;  %v433_v60 = vld [vmem:[%s577_s3 + $0x18] sm:$0xff]  }
   0x7   :  { %390 = vmatpush3.bf16.msra.mxu0 %v424_v2 }
   0x8   :  { %391 = vmatprep.subr.bf16.mxu0 %v438_v0  ;;  %400 = vmatpush3.bf16.msra.mxu1 %v427_v8 }
   0x9   :  { %401 = vmatprep.subr.bf16.mxu1 %v438_v0 }
   0xb   :  { %392 = vmatpush3.bf16.msra.mxu0 %v425_v3 }
   0xc   :  { %409 = vmatprep.subr.bf16.mxu0 %v438_v0  ;;  %402 = vmatpush3.bf16.msra.mxu1 %v428_v9 }
   0xd   :  { %403 = vmatprep.subr.bf16.mxu1 %v438_v0 }
   0xe   :  { %394 = vmatmul.mubr.msk.bf16.vlgmr.msra.gmra.mrb[0].mxu0 %vm70_vm1, %v29_v6 }
   0xf   :  { %417 = vmatprep.mubr.msk.bf16.mxu0 %vm439_vm0, %v438_v0  ;;  %410 = vmatpush3.bf16.msra.mxu0 %v430_v57 }
  0x10   :  { %404 = vmatpush3.bf16.msra.mxu1 %v429_v10  ;;  %411 = vmatprep.subr.bf16.mxu0 %v438_v0 }
  0x13   :  { %412 = vmatpush3.bf16.msra.mxu0 %v431_v58 }
  0x14   :  { %413 = vmatprep.subr.bf16.mxu0 %v438_v0 }
  0x17   :  { %414 = vmatpush3.bf16.msra.mxu0 %v432_v59 }
  0x18   :  { %415 = vmatprep.subr.bf16.mxu0 %v438_v0 }
  0x1b   :  { %416 = vmatpush3.bf16.msra.mxu0 %v433_v60 }
  0xe1   :  { %v108_v11 = vpop.f32.mrb[0].mxu0 }
  0xe2   :  { %v127_v12 = vmul.f32 %v108_v11, %v108_v11  ;;  %v395_v13 = vpop.f32.mrb[1].mxu0  ;;  %v116_v15 = vsel %vm115_vm2, %v108_v11, 0.0 }
  0xe3   :  { %v111_v14 = vpop.f32.mrb[2].mxu0 }
  0xe4   :  { %v118_v16 = vsel %vm117_vm3, %v111_v14, 0.0  ;;  %v128_v17 = vmul.f32 %v111_v14, %v111_v14  ;;  %v396_v18 = vpop.f32.mrb[3].mxu0  ;;  %v129_v20 = vsel %vm115_vm2, %v127_v12, 0.0 }
  0xe5   :  { %v119_v19 = vadd.f32 %v118_v16, %v116_v15 }
  0xe6   :  { %v130_v21 = vsel %vm117_vm3, %v128_v17, 0.0 }
  0xe7   :  { %v120_v22 = vrot.slane %v119_v19, 4  ;;  %v131_v23 = vadd.f32 %v130_v21, %v129_v20 }
  0xe9   :  { %v121_v24 = vadd.f32 %v120_v22, %v119_v19  ;;  %v132_v25 = vrot.slane %v131_v23, 4 }
  0xeb   :  { %v122_v26 = vrot.slane %v121_v24, 2  ;;  %v133_v27 = vadd.f32 %v132_v25, %v131_v23 }
  0xed   :  { %v123_v28 = vadd.f32 %v122_v26, %v121_v24  ;;  %v134_v29 = vrot.slane %v133_v27, 2 }
  0xef   :  { %v124_v30 = vrot.slane %v123_v28, 1  ;;  %v135_v31 = vadd.f32 %v134_v29, %v133_v27  ;;  %v255_v27 = vld [vmem:[%s578_s5] sm:$0x1] }
  0xf1   :  { %v125_v32 = vadd.f32 %v124_v30, %v123_v28  ;;  %v136_v33 = vrot.slane %v135_v31, 1  ;;  %v259_v30 = vld [vmem:[%s578_s5 + $0x1] sm:$0x1] }
  0xf3   :  { %v126_v34 = vmul.f32 0.083333336, %v125_v32  ;;  %v137_v35 = vadd.f32 %v136_v33, %v135_v31 }
  0xf5   :  { %v138_v36 = vmul.f32 0.083333336, %v137_v35  ;;  %v139_v37 = vmul.f32 %v126_v34, %v126_v34 }
  0xf7   :  { %v140_v38 = vsub.f32 %v138_v36, %v139_v37 }
  0xf9   :  { %v141_v39 = vmax.f32 %v140_v38, 0.0 }
  0xfb   :  { %v143_v40 = vadd.f32 1e-05, %v141_v39 }
  0xfd   :  { %434 = vrsqrt.f32 %v143_v40  ;;  %v367_v40 = vld [vmem:[%s579_s6] ss:$0 sm:$0xff] }
 0x107   :  { %v435_v45 = vpop.eup %434 }
 0x108   :  { %v145_v46 = vmul.f32 %v435_v45, %v142_v43 }
 0x10a   :  { %v147_v48 = vmul.f32 %v145_v46, %v126_v34  ;;  %v152_v49 = vrot.slane %v145_v46, %v528_v44 }
 0x10c   :  { %v148_v50 = vsub.f32 %v146_v47, %v147_v48  ;;  %v153_v51 = vmul.f32 %v152_v49, %v108_v11  ;;  %v154_v52 = vmul.f32 %v152_v49, %v111_v14 }
 0x10e   :  { %v158_v53 = vrot.slane %v148_v50, %v528_v44 }
 0x110   :  { %v160_v54 = vadd.f32 %v158_v53, %v154_v52  ;;  %v159_v55 = vadd.f32 %v158_v53, %v153_v51 }
 0x112   :  { %v161_v56 = vpack.c.bf16 %v160_v54, %v159_v55 }
 0x114   :  { %406 = vmatmul.mubr.msk.bf16.vlgmr.msra.gmra.mrb[0].mxu1 %vm115_vm2, %v161_v56 }
 0x1e7   :  { %v223_v61 = vpop.f32.mrb[0].mxu1 }
 0x1e8   :  { %v240_v62 = vmul.f32 %v223_v61, %v223_v61  ;;  %v407_v63 = vpop.f32.mrb[1].mxu1  ;;  %v230_v2 = vsel %vm115_vm2, %v223_v61, 0.0 }
 0x1e9   :  { %v226_v1 = vpop.f32.mrb[2].mxu1 }
 0x1ea   :  { %v231_v3 = vsel %vm117_vm3, %v226_v1, 0.0  ;;  %v241_v4 = vmul.f32 %v226_v1, %v226_v1  ;;  %v408_v5 = vpop.f32.mrb[3].mxu1  ;;  %v242_v7 = vsel %vm115_vm2, %v240_v62, 0.0 }
 0x1eb   :  { %v232_v6 = vadd.f32 %v231_v3, %v230_v2 }
 0x1ec   :  { %v243_v0 = vsel %vm117_vm3, %v241_v4, 0.0 }
 0x1ed   :  { %v233_v8 = vrot.slane %v232_v6, 4  ;;  %v244_v9 = vadd.f32 %v243_v0, %v242_v7 }
 0x1ef   :  { %v234_v10 = vadd.f32 %v233_v8, %v232_v6  ;;  %v245_v11 = vrot.slane %v244_v9, 4 }
 0x1f1   :  { %v235_v12 = vrot.slane %v234_v10, 2  ;;  %v246_v13 = vadd.f32 %v245_v11, %v244_v9 }
 0x1f3   :  { %v236_v14 = vadd.f32 %v235_v12, %v234_v10  ;;  %v247_v15 = vrot.slane %v246_v13, 2 }
 0x1f5   :  { %v237_v16 = vrot.slane %v236_v14, 1  ;;  %v248_v17 = vadd.f32 %v247_v15, %v246_v13 }
 0x1f7   :  { %v238_v18 = vadd.f32 %v237_v16, %v236_v14  ;;  %v249_v19 = vrot.slane %v248_v17, 1 }
 0x1f9   :  { %v239_v20 = vmul.f32 0.083333336, %v238_v18  ;;  %v250_v21 = vadd.f32 %v249_v19, %v248_v17 }
 0x1fb   :  { %v251_v22 = vmul.f32 0.083333336, %v250_v21  ;;  %v252_v23 = vmul.f32 %v239_v20, %v239_v20 }
 0x1fd   :  { %v253_v24 = vsub.f32 %v251_v22, %v252_v23 }
 0x1ff   :  { %v254_v25 = vmax.f32 %v253_v24, 0.0 }
 0x201   :  { %v256_v26 = vadd.f32 1e-05, %v254_v25 }
 0x203   :  { %436 = vrsqrt.f32 %v256_v26 }
 0x20d   :  { %v437_v28 = vpop.eup %436 }
 0x20e   :  { %v258_v29 = vmul.f32 %v437_v28, %v255_v27 }
 0x210   :  { %v260_v31 = vmul.f32 %v258_v29, %v239_v20  ;;  %v265_v32 = vrot.slane %v258_v29, %v528_v44 }
 0x212   :  { %v261_v33 = vsub.f32 %v259_v30, %v260_v31  ;;  %v266_v34 = vmul.f32 %v265_v32, %v223_v61  ;;  %v267_v35 = vmul.f32 %v265_v32, %v226_v1 }
 0x214   :  { %v271_v36 = vrot.slane %v261_v33, %v528_v44 }
 0x216   :  { %v272_v37 = vadd.f32 %v271_v36, %v266_v34  ;;  %v273_v38 = vadd.f32 %v271_v36, %v267_v35 }
 0x218   :  { %v274_v39 = vpack.c.bf16 %v273_v38, %v272_v37 }
 0x21a   :  { %418 = vmatmul.mubr.msk.bf16.vlgmr.msra.gmra.mrb[4].mxu0 %vm115_vm2, %v274_v39 }
 0x2ed   :  { %v343_v41 = vpop.f32.mrb[4].mxu0 }
 0x2ee   :  { %v344_v42 = vadd.f32 %v367_v40, %v343_v41  ;;  %v419_v43 = vpop.f32.mrb[5].mxu0 }
 0x2ef   :  { %v346_v45 = vpop.f32.mrb[6].mxu0 }
 0x2f0   :  { %351 = vst.msk [vmem:[%s580_s7] sm:$0xff] %vm350_vm4, %v344_v42  ;;  %v347_v44 = vadd.f32 %v367_v40, %v346_v45  ;;  %v420_v46 = vpop.f32.mrb[7].mxu0 }
 0x2f2   :  { %353 = vst.msk [vmem:[%s580_s7 + $0x8] sm:$0xf] %vm352_vm5, %v347_v44 }

</bundles_post_ra>
